<compile_context>
chip_gen: v6e
topology: v6e:2x2x1
jax: 0.10.0
libtpu: 0.0.40
codegen_flags: <defaults>
</compile_context>

<pallas_src>
import math
from functools import partial

import jax
import jax.numpy as jnp
from jax.experimental import pallas as pl
from jax.experimental.pallas import tpu as pltpu


_LANE = 128
_ROW_TILE_MAX = 2048                    # 2048 * 128 * 4 B = 1 MiB per f32 tile
_VMEM_LIMIT_BYTES = 32 * 1024 * 1024    # explicit, safe on v5e/v6e/v7x


def _round_up(x, m):
    return (x + m - 1) // m * m


def _tiling(trailing_size):
    """Rows-of-128 view of one sample's flattened payload + row-tile size."""
    rows = pl.cdiv(trailing_size, _LANE)
    row_tile = min(_ROW_TILE_MAX, _round_up(rows, 8))
    rows_padded = _round_up(rows, row_tile)
    return rows_padded, row_tile


def _to_lane_dense(x, rows_padded):
    """(B, ...) -> zero-padded, lane-dense (B, rows_padded, 128)."""
    b = x.shape[0]
    l = math.prod(x.shape[1:])
    x_flat = x.reshape(b, l)
    pad = rows_padded * _LANE - l
    if pad:
        x_flat = jnp.pad(x_flat, ((0, 0), (0, pad)))
    return x_flat.reshape(b, rows_padded, _LANE)


def _per_sample_scale(key, batch, keep_prob):
    # Mask math in float32 (avoids bf16 rounding of keep_prob + u flipping
    # borderline samples); kept as f32 in SMEM and cast to the activation
    # dtype as a scalar inside the kernel.
    u = jax.random.uniform(key, (batch,), dtype=jnp.float32)
    mask = jnp.floor(keep_prob + u)              # 0.0 or 1.0
    return mask / jnp.float32(keep_prob)         # 0.0 or 1/keep_prob


def _scale_add_kernel(scale_ref, branch_ref, shortcut_ref, o_ref):
    b = pl.program_id(0)
    s = scale_ref[b].astype(o_ref.dtype)         # hoisted scalar broadcast,
    o_ref[...] = shortcut_ref[...] + branch_ref[...] * s   # native dtype math


def _scale_kernel(scale_ref, branch_ref, o_ref):
    b = pl.program_id(0)
    s = scale_ref[b].astype(o_ref.dtype)
    o_ref[...] = branch_ref[...] * s


def _launch(kernel, scale, tensors, out_dtype, rows_padded, row_tile):
    b = tensors[0].shape[0]
    grid = (b, rows_padded // row_tile)
    tile_spec = pl.BlockSpec((1, row_tile, _LANE), lambda bi, ti: (bi, ti, 0))
    return pl.pallas_call(
        kernel,
        out_shape=jax.ShapeDtypeStruct((b, rows_padded, _LANE), out_dtype),
        grid=grid,
        in_specs=[pl.BlockSpec(memory_space=pltpu.MemorySpace.SMEM)]
                 + [tile_spec] * len(tensors),
        out_specs=tile_spec,
        input_output_aliases={1: 0},             # branch buffer -> output
        compiler_params=pltpu.CompilerParams(
            dimension_semantics=("parallel", "parallel"),
            vmem_limit_bytes=_VMEM_LIMIT_BYTES),
    )(scale, *tensors)


@partial(jax.jit, static_argnames=("drop_prob", "training"))
def drop_path_add(branch, shortcut, key, *, drop_prob=0.0, training=False):
    """Fused DropPath + residual add: shortcut + drop_path(branch)."""
    assert branch.shape == shortcut.shape
    if drop_prob == 0.0 or not training:
        return branch + shortcut                 # identity DropPath

    keep_prob = 1.0 - float(drop_prob)
    b = branch.shape[0]
    l = math.prod(branch.shape[1:])
    rows_padded, row_tile = _tiling(l)

    scale = _per_sample_scale(key, b, keep_prob)
    branch_p = _to_lane_dense(branch, rows_padded)
    shortcut_p = _to_lane_dense(shortcut, rows_padded)

    out = _launch(_scale_add_kernel, scale, (branch_p, shortcut_p),
                  branch.dtype, rows_padded, row_tile)
    return out.reshape(b, rows_padded * _LANE)[:, :l].reshape(branch.shape)


@partial(jax.jit, static_argnames=("drop_prob", "training"))
def drop_path_pallas(x, key, *, drop_prob=0.0, training=False):
    """Standalone DropPath (same semantics as the PyTorch drop_path)."""
    if drop_prob == 0.0 or not training:
        return x

    keep_prob = 1.0 - float(drop_prob)
    b = x.shape[0]
    l = math.prod(x.shape[1:])
    rows_padded, row_tile = _tiling(l)

    scale = _per_sample_scale(key, b, keep_prob)
    x_p = _to_lane_dense(x, rows_padded)

    out = _launch(_scale_kernel, scale, (x_p,), x.dtype, rows_padded, row_tile)
    return out.reshape(b, rows_padded * _LANE)[:, :l].reshape(x.shape)


class DropPath:
    """Minimal JAX mirror of the PyTorch DropPath module (standalone form)."""

    def __init__(self, drop_prob=None):
        self.drop_prob = 0.0 if drop_prob is None else float(drop_prob)
        self.training = True

    def __call__(self, x, key):
        return drop_path_pallas(x, key, drop_prob=self.drop_prob,
                                training=self.training)


if __name__ == "__main__":
    key = jax.random.PRNGKey(0)
    k_b, k_s, k_mask, k_b2, k_s2, k_mask2 = jax.random.split(key, 6)

    drop_prob = 0.25
    keep_prob = 1.0 - drop_prob

    # --- fused DropPath + residual add (MBConv use_res_connect path) ---
    B, C, H, W = 2, 4, 16, 16
    branch = jax.random.normal(k_b, (B, C, H, W), dtype=jnp.float32)
    shortcut = jax.random.normal(k_s, (B, C, H, W), dtype=jnp.float32)

    out = jax.block_until_ready(
        drop_path_add(branch, shortcut, k_mask,
                      drop_prob=drop_prob, training=True))

    u = jax.random.uniform(k_mask, (B,), dtype=jnp.float32)
    mask = jnp.floor(keep_prob + u).reshape(B, 1, 1, 1)
    ref = shortcut + branch / keep_prob * mask
    assert jnp.allclose(out, ref, atol=1e-5, rtol=1e-5), "fused f32 mismatch"

    # --- non-128-divisible spatial size (late-stage 7x7) exercises padding ---
    B2, C2, H2, W2 = 2, 8, 7, 7
    branch2 = jax.random.normal(k_b2, (B2, C2, H2, W2), dtype=jnp.float32)
    shortcut2 = jax.random.normal(k_s2, (B2, C2, H2, W2), dtype=jnp.float32)
    out2 = jax.block_until_ready(
        drop_path_add(branch2, shortcut2, k_mask2,
                      drop_prob=drop_prob, training=True))
    u2 = jax.random.uniform(k_mask2, (B2,), dtype=jnp.float32)
    mask2 = jnp.floor(keep_prob + u2).reshape(B2, 1, 1, 1)
    ref2 = shortcut2 + branch2 / keep_prob * mask2
    assert jnp.allclose(out2, ref2, atol=1e-5, rtol=1e-5), "fused padded mismatch"

    # --- standalone DropPath (module API) ---
    module = DropPath(drop_prob)
    module.training = True
    out_dp = jax.block_until_ready(module(branch, k_mask))
    ref_dp = branch / keep_prob * mask
    assert jnp.allclose(out_dp, ref_dp, atol=1e-5, rtol=1e-5), "standalone mismatch"

    # eval / drop_prob=0 -> identity (no kernel launch)
    module.training = False
    out_eval = jax.block_until_ready(module(branch, k_mask))
    assert jnp.array_equal(out_eval, branch)

    # --- bf16 activations: multiply stays in bf16 inside the kernel ---
    branch_bf = branch.astype(jnp.bfloat16)
    shortcut_bf = shortcut.astype(jnp.bfloat16)
    out_bf = jax.block_until_ready(
        drop_path_add(branch_bf, shortcut_bf, k_mask,
                      drop_prob=drop_prob, training=True))
    ref_bf = (shortcut_bf.astype(jnp.float32)
              + branch_bf.astype(jnp.float32) / keep_prob * mask)
    assert jnp.allclose(out_bf.astype(jnp.float32), ref_bf,
                        atol=1e-1, rtol=5e-2), "bf16 mismatch"

    print("KERNEL_OK")
</pallas_src>

<mosaic_0001>
module attributes {stable_mosaic.version = 11 : i64} {
  func.func @_scale_add_kernel(%arg0: i32, %arg1: i32, %arg2: memref<2xf32, #tpu.memory_space<smem>>, %arg3: memref<1x8x128xf32, #tpu.memory_space<vmem>>, %arg4: memref<1x8x128xf32, #tpu.memory_space<vmem>>, %arg5: memref<1x8x128xf32, #tpu.memory_space<vmem>>) attributes {dimension_semantics = [#tpu.dimension_semantics<parallel>, #tpu.dimension_semantics<parallel>], iteration_bounds = array<i64: 2, 1>, scalar_prefetch = 0 : i64, scratch_operands = 0 : i64, tpu.core_type = #tpu.core_type<tc>, window_params = [{transform_indices = @transform_0, window_bounds = array<i64: 2>}, {transform_indices = @transform_1, window_bounds = array<i64: 1, 8, 128>}, {transform_indices = @transform_2, window_bounds = array<i64: 1, 8, 128>}, {transform_indices = @transform_3, window_bounds = array<i64: 1, 8, 128>}]} {
    %0 = arith.index_cast %arg0 : i32 to index
    %1 = memref.load %arg2[%0] : memref<2xf32, #tpu.memory_space<smem>>
    %c0 = arith.constant 0 : index
    %c0_0 = arith.constant 0 : index
    %c0_1 = arith.constant 0 : index
    %2 = vector.load %arg4[%c0, %c0_0, %c0_1] : memref<1x8x128xf32, #tpu.memory_space<vmem>>, vector<1x8x128xf32>
    %c0_2 = arith.constant 0 : index
    %c0_3 = arith.constant 0 : index
    %c0_4 = arith.constant 0 : index
    %3 = vector.load %arg3[%c0_2, %c0_3, %c0_4] : memref<1x8x128xf32, #tpu.memory_space<vmem>>, vector<1x8x128xf32>
    %4 = vector.broadcast %1 : f32 to vector<1x8x128xf32>
    %5 = arith.mulf %3, %4 : vector<1x8x128xf32>
    %6 = arith.addf %2, %5 : vector<1x8x128xf32>
    %c0_5 = arith.constant 0 : index
    %c0_6 = arith.constant 0 : index
    %c0_7 = arith.constant 0 : index
    %7 = vector.load %arg5[%c0_5, %c0_6, %c0_7] : memref<1x8x128xf32, #tpu.memory_space<vmem>>, vector<1x8x128xf32>
    tpu.vector_store %arg5[%c0_5, %c0_6, %c0_7], %6 {strides = array<i32>} : memref<1x8x128xf32, #tpu.memory_space<vmem>>, vector<1x8x128xf32>,
    return
  }
  func.func @transform_0(%arg0: i32, %arg1: i32) -> i32 {
    %c0_i32 = arith.constant 0 : i32
    %c0_i32_0 = arith.constant 0 : i32
    return %c0_i32 : i32
  }
  func.func @transform_1(%arg0: i32, %arg1: i32) -> (i32, i32, i32) {
    %c0_i32 = arith.constant 0 : i32
    %c0_i32_0 = arith.constant 0 : i32
    return %arg0, %arg1, %c0_i32 : i32, i32, i32
  }
  func.func @transform_2(%arg0: i32, %arg1: i32) -> (i32, i32, i32) {
    %c0_i32 = arith.constant 0 : i32
    %c0_i32_0 = arith.constant 0 : i32
    return %arg0, %arg1, %c0_i32 : i32, i32, i32
  }
  func.func @transform_3(%arg0: i32, %arg1: i32) -> (i32, i32, i32) {
    %c0_i32 = arith.constant 0 : i32
    %c0_i32_0 = arith.constant 0 : i32
    return %arg0, %arg1, %c0_i32 : i32, i32, i32
  }
}

</mosaic_0001>

<bundles_post_ra>
// kernel: drop_path_add.1
= control target key start
LH: loop header
LB: loop body
LE: loop exit
PB: predicated region body
PF: predicated region fallthrough
CT: control target
= control target key end

     0   :  { %8 = vsyncpa [#allocation3], 0  ;;  %s459_s12 = smov 0   ;;  %s461_s13 = smov 0   ;;  %s522_s0 = inlined_call_operand.vmem [shape: f32[2], index: 0, kind: input, shape index: {}]   ;;  %s523_s1 = inlined_call_operand.vmem [shape: f32[2,8,128], index: 1, kind: input, shape index: {}, may-alias: {1,3}]   ;;  %s524_s2 = inlined_call_operand.vmem [shape: f32[2,8,128], index: 2, kind: input, shape index: {}]   ;;  %s525_s3 = inlined_call_operand.vmem [shape: f32[2,8,128], index: 3, kind: output, shape index: {}, may-alias: {1,3}]  }
   0x1   :  { %s463_s14 = smov 0  }
   0x2 LB: > { %s348_s15 = sadd.s32 4294967295, %s436_s14   ;;  %s26_s16 = sadd.s32 1, %s432_s13  ;;  %s436_s14 = sphi %s463_s14, %s14_s14   ;;  %s432_s13 = sphi %s461_s13, %s529_s13   ;;  %s428_s12 = sphi %s459_s12, %s528_s12  }
   0x3   : > { %p28_p0 = scmp.ge.s32.totalorder %s26_s16, 2  ;;  %p350_p1 = scmp.ge.s32.totalorder %s436_s14, 1 }
   0x4   : > { %p136_p2 = scmp.lt.s32.totalorder %s436_s14, 3  ;;  %p484_p4 = scmp.eq.s32.totalorder %s348_s15, 0 }
   0x5   : > { %s531_s16 = smov (%p28_p0, %s26_s16), 0  ;;  %s149_s21 = sshll.u32 %s522_s0, 4  ;;  %s150_s21 = int_to_ptr.vmem [resolvable:$true] %s149_s21 }
   0x6   : > { %p480_p3 = pnand %p350_p1, %p136_p2  ;;  %s395_s22 = scalar_lea.vmem %s150_s21, 16 }
   0x7   : > { %p396_p7 = scmp.ne.s32.totalorder %s150_s21, %s395_s22  ;;  %p403_p11 = scmp.lt.s32.totalorder %s150_s21, %s150_s21 }
   0x8   : > { %p364_p5 = pneg %p480_p3  ;;  %p404_p12 = scmp.lt.s32.totalorder %s395_s22, %s395_s22 }
   0xa   : > { %p365_p6 = pnand %p484_p4, %p364_p5  ;;  %p405_p13 = por %p404_p12, %p403_p11 }
   0xc   : > { %p397_p8 = pneg %p365_p6 }
   0xe   : > { %p398_p9 = pnand %p397_p8, %p396_p7 }
  0x10   : > { %p399_p10 = pneg %p398_p9 }
  0x12   : > { %p406_p0 = pnand %p405_p13, %p399_p10 }
  0x14   : > { %409 = shalt.err (!%p406_p0)
}
  0x15   : > { %s438_s23 = smov [#allocation2]   ;;  %182 = sbr.rel (%p480_p3) target bundleno = 41 (0x29), region = 32 }
  0x16   : > { %367 = dma.vmem_to_smem (!%p365_p6), %s150_s21, 16, %s438_s23, [#allocation3]  }
  0x1a   : > { %423 = dma.done.wait (%p484_p4), [#allocation3], 16  }
  0x1b   : > { %425 = vsyncadd (%p484_p4), [#allocation3], 4294967280 }
  0x1c   : > { %188 = sfence }
  0x1d   : > { %p218_p1 = scmp.lt.s32.totalorder %s428_s12, 1  ;;  %s239_s24 = sld [smem:[#allocation2 + %s428_s12]] }
  0x1f   : > { %s533_s12 = smov (!%p218_p1, %s428_s12), 1 }
  0x20   : > { %s355_s25 = sshll.u32 %s533_s12, 3 }
  0x21   : > { %s224_s28 = scalar_lea.vmem %s523_s1, %s355_s25  ;;  %s231_s4 = scalar_lea.vmem %s524_s2, %s355_s25 }
  0x22   : > { %v240_v0 = vld [vmem:[%s231_s4] sm:$0xff]  ;;  %s238_s7 = scalar_lea.vmem %s525_s3, %s355_s25 }
  0x23   : > { %v241_v1 = vld [vmem:[%s224_s28] sm:$0xff]  ;;  %v242_v2 = vstv %s239_s24 }
  0x24   : > { %v243_v3 = vmul.f32 %v242_v2, %v241_v1 }
  0x26   : > { %v244_v4 = vadd.f32 %v243_v3, %v240_v0 }
  0x28   : > { %245 = vst [vmem:[%s238_s7] sm:$0xff] %v244_v4 }
  0x29 PF: > { %s14_s14 = sadd.s32 1, %s436_s14   ;;  %s528_s12 = smov %s432_s13 }
  0x2a   : > { %p11_p2 = scmp.ge.s32.totalorder %s14_s14, 4   ;;  %s529_s13 = smov %s531_s16 }
  0x2c   :  { %13 = sbr.rel (!%p11_p2) target bundleno = 2 (0x2), region = 70 }
  0x31   :  { %271 = vsyncpa [#allocation3], 1 }
  0x32   :  { %273 = vsyncpa [#allocation3 + $0x1], 1 }

</bundles_post_ra>
